<compile_context>
chip_gen: v6e
topology: v6e:2x2x1
jax: 0.10.0
libtpu: 0.0.40
codegen_flags: <defaults>
</compile_context>

<pallas_src>
import jax
import jax.numpy as jnp
from jax.experimental import pallas as pl
from jax.experimental.pallas import tpu as pltpu


HIDDEN = 256


def _cdiv(a, b):
    return (a + b - 1) // b


def _round_up(x, m):
    return _cdiv(x, m) * m


def critic_kernel(state_ref, action_ref, w1_ref, b1_ref, w2_ref, b2_ref,
                  w3_ref, b3_ref, q_ref):
    # Layer 1: fuse state/action along the lane axis, single MXU matmul over
    # K = S + A (bf16 operands, f32 accumulation).
    x = jnp.concatenate([state_ref[...], action_ref[...]], axis=-1)
    h1 = jnp.dot(x.astype(jnp.bfloat16), w1_ref[...],
                 preferred_element_type=jnp.float32) + b1_ref[...]
    h1 = jnp.maximum(h1, 0.0)

    # Layer 2: 256x256, bf16 MXU, f32 accumulate; bias + ReLU on VPU in f32.
    h2 = jnp.dot(h1.astype(jnp.bfloat16), w2_ref[...],
                 preferred_element_type=jnp.float32) + b2_ref[...]
    h2 = jnp.maximum(h2, 0.0)

    # Layer 3 (256 -> 1): VPU multiply + XLU lane reduction; skip the 1-column MXU pass.
    q = jnp.sum(h2 * w3_ref[...], axis=-1, keepdims=True) + b3_ref[0, 0]
    q_ref[...] = q.astype(q_ref.dtype)


def prepare_critic_params(params):
    """One-time weight prep (cast / reshape) hoisted out of the forward hot path."""
    w1, b1, w2, b2, w3, b3 = params
    return (
        w1.astype(jnp.bfloat16),                       # [S+A, 256]  (unsplit)
        b1.astype(jnp.float32).reshape(1, HIDDEN),     # [1, 256]
        w2.astype(jnp.bfloat16),                       # [256, 256]
        b2.astype(jnp.float32).reshape(1, HIDDEN),     # [1, 256]
        w3.astype(jnp.float32).reshape(1, HIDDEN),     # [1, 256]  (VPU side)
        b3.astype(jnp.float32).reshape(1, 1),          # [1, 1] scalar -> SMEM
    )


def critic_forward(state, action, prepared_params, *,
                   batch_tile=2048, min_batch_tiles=2):
    """Pallas-backed Critic forward. state: [B, S], action: [B, A] -> q: [B, 1]."""
    w1, b1, w2, b2, w3_row, b3 = prepared_params
    B, S = state.shape
    A = action.shape[1]
    K = S + A
    assert w1.shape == (K, HIDDEN), (w1.shape, K)

    state = state.astype(jnp.float32)
    action = action.astype(jnp.float32)

    # Tile selection: at least `min_batch_tiles` tiles (so the parallel batch axis
    # can shard across both v7x TensorCores), tiles capped at `batch_tile`, and the
    # tile size always rounded to a multiple of 8 sublanes.  Padding waste < bt rows.
    nb = max(min_batch_tiles, _cdiv(B, batch_tile))
    bt = _round_up(_cdiv(B, nb), 8)
    nb = _cdiv(B, bt)
    B_pad = nb * bt
    if B_pad != B:
        state = jnp.pad(state, ((0, B_pad - B), (0, 0)))
        action = jnp.pad(action, ((0, B_pad - B), (0, 0)))

    grid_spec = pltpu.PrefetchScalarGridSpec(
        num_scalar_prefetch=0,
        grid=(nb,),
        in_specs=[
            pl.BlockSpec((bt, S), lambda i: (i, 0)),            # state tile
            pl.BlockSpec((bt, A), lambda i: (i, 0)),            # action tile
            pl.BlockSpec((K, HIDDEN), lambda i: (0, 0)),        # w1 (resident)
            pl.BlockSpec((1, HIDDEN), lambda i: (0, 0)),        # b1
            pl.BlockSpec((HIDDEN, HIDDEN), lambda i: (0, 0)),   # w2 (resident)
            pl.BlockSpec((1, HIDDEN), lambda i: (0, 0)),        # b2
            pl.BlockSpec((1, HIDDEN), lambda i: (0, 0)),        # w3 row
            pl.BlockSpec(memory_space=pltpu.MemorySpace.SMEM),  # b3 scalar
        ],
        out_specs=pl.BlockSpec((bt, 1), lambda i: (i, 0)),
    )

    q = pl.pallas_call(
        critic_kernel,
        out_shape=jax.ShapeDtypeStruct((B_pad, 1), jnp.float32),
        grid_spec=grid_spec,
        compiler_params=pltpu.CompilerParams(
            dimension_semantics=("parallel",),
            vmem_limit_bytes=48 * 1024 * 1024),
    )(state, action, w1, b1, w2, b2, w3_row, b3)

    return q[:B]


def init_critic_params(key, state_dim, action_dim):
    """Deterministic init mimicking PyTorch nn.Linear defaults:
    U(-1/sqrt(fan_in), 1/sqrt(fan_in)) for both weight and bias.
    Weights stored as [in_features, out_features]."""
    in_dim = state_dim + action_dim
    k1, k2, k3, k4, k5, k6 = jax.random.split(key, 6)

    def uniform(k, shape, fan_in):
        bound = 1.0 / jnp.sqrt(jnp.float32(fan_in))
        return jax.random.uniform(k, shape, jnp.float32, -bound, bound)

    w1 = uniform(k1, (in_dim, HIDDEN), in_dim)
    b1 = uniform(k2, (1, HIDDEN), in_dim)
    w2 = uniform(k3, (HIDDEN, HIDDEN), HIDDEN)
    b2 = uniform(k4, (1, HIDDEN), HIDDEN)
    w3 = uniform(k5, (HIDDEN, 1), HIDDEN)
    b3 = uniform(k6, (1, 1), HIDDEN)
    return (w1, b1, w2, b2, w3, b3)


def critic_reference(state, action, params):
    """Pure-JAX reference with the same bf16-MXU / f32-accumulate numerics."""
    w1, b1, w2, b2, w3, b3 = params
    x = jnp.concatenate([state, action], axis=1).astype(jnp.float32)
    h1 = jnp.maximum(
        jnp.dot(x.astype(jnp.bfloat16), w1.astype(jnp.bfloat16),
                preferred_element_type=jnp.float32) + b1, 0.0)
    h2 = jnp.maximum(
        jnp.dot(h1.astype(jnp.bfloat16), w2.astype(jnp.bfloat16),
                preferred_element_type=jnp.float32) + b2, 0.0)
    return jnp.sum(h2 * w3.reshape(1, HIDDEN), axis=-1, keepdims=True) + b3


if __name__ == "__main__":
    key = jax.random.PRNGKey(0)
    k_state, k_action, k_params = jax.random.split(key, 3)

    batch, state_dim, action_dim = 4, 16, 8
    state = jax.random.normal(k_state, (batch, state_dim), jnp.float32)
    action = jax.random.normal(k_action, (batch, action_dim), jnp.float32)
    params = init_critic_params(k_params, state_dim, action_dim)

    # Weight prep hoisted out of the hot path (done once).
    prepared = prepare_critic_params(params)

    q = critic_forward(state, action, prepared)
    q = jax.block_until_ready(q)

    q_ref = critic_reference(state, action, params)
    assert q.shape == (batch, 1), q.shape
    assert jnp.allclose(q, q_ref, atol=2e-3, rtol=2e-3), (q, q_ref)

    print("KERNEL_OK")
</pallas_src>

<mosaic_0001>
module attributes {stable_mosaic.version = 11 : i64} {
  func.func @critic_kernel(%arg0: i32, %arg1: memref<8x16xf32, #tpu.memory_space<vmem>>, %arg2: memref<8x8xf32, #tpu.memory_space<vmem>>, %arg3: memref<24x256xbf16, #tpu.memory_space<vmem>>, %arg4: memref<1x256xf32, #tpu.memory_space<vmem>>, %arg5: memref<256x256xbf16, #tpu.memory_space<vmem>>, %arg6: memref<1x256xf32, #tpu.memory_space<vmem>>, %arg7: memref<1x256xf32, #tpu.memory_space<vmem>>, %arg8: memref<1x1xf32, #tpu.memory_space<smem>>, %arg9: memref<8x1xf32, #tpu.memory_space<vmem>>) attributes {dimension_semantics = [#tpu.dimension_semantics<parallel>], iteration_bounds = array<i64: 1>, scalar_prefetch = 0 : i64, scratch_operands = 0 : i64, tpu.core_type = #tpu.core_type<tc>, window_params = [{transform_indices = @transform_0, window_bounds = array<i64: 8, 16>}, {transform_indices = @transform_1, window_bounds = array<i64: 8, 8>}, {pipeline_mode = #tpu.pipeline_mode<synchronous>, transform_indices = @transform_2, window_bounds = array<i64: 24, 256>}, {pipeline_mode = #tpu.pipeline_mode<synchronous>, transform_indices = @transform_3, window_bounds = array<i64: 1, 256>}, {pipeline_mode = #tpu.pipeline_mode<synchronous>, transform_indices = @transform_4, window_bounds = array<i64: 256, 256>}, {pipeline_mode = #tpu.pipeline_mode<synchronous>, transform_indices = @transform_5, window_bounds = array<i64: 1, 256>}, {pipeline_mode = #tpu.pipeline_mode<synchronous>, transform_indices = @transform_6, window_bounds = array<i64: 1, 256>}, {transform_indices = @transform_7, window_bounds = array<i64: 1, 1>}, {transform_indices = @transform_8, window_bounds = array<i64: 8, 1>}]} {
    %c0 = arith.constant 0 : index
    %c0_0 = arith.constant 0 : index
    %0 = vector.load %arg1[%c0, %c0_0] : memref<8x16xf32, #tpu.memory_space<vmem>>, vector<8x16xf32>
    %c0_1 = arith.constant 0 : index
    %c0_2 = arith.constant 0 : index
    %1 = vector.load %arg2[%c0_1, %c0_2] : memref<8x8xf32, #tpu.memory_space<vmem>>, vector<8x8xf32>
    %2 = tpu.concatenate %0, %1 in 1 : vector<8x16xf32>, vector<8x8xf32> -> vector<8x24xf32>
    %3 = arith.truncf %2 : vector<8x24xf32> to vector<8x24xbf16>
    %c0_3 = arith.constant 0 : index
    %c0_4 = arith.constant 0 : index
    %4 = vector.load %arg3[%c0_3, %c0_4] : memref<24x256xbf16, #tpu.memory_space<vmem>>, vector<24x256xbf16>
    %cst = arith.constant dense<0.000000e+00> : vector<8x256xf32>
    %5 = tpu.matmul %3, %4, %cst {dimension_numbers = #tpu.dot_dimension_numbers<[1], [0], [0], [1], [0, 0, 1, 1], [], []>} : vector<8x24xbf16>, vector<24x256xbf16>, vector<8x256xf32> -> vector<8x256xf32>
    %c0_5 = arith.constant 0 : index
    %c0_6 = arith.constant 0 : index
    %6 = vector.load %arg4[%c0_5, %c0_6] : memref<1x256xf32, #tpu.memory_space<vmem>>, vector<1x256xf32>
    %7 = vector.broadcast %6 : vector<1x256xf32> to vector<8x256xf32>
    %8 = arith.addf %5, %7 : vector<8x256xf32>
    %cst_7 = arith.constant 0.000000e+00 : f32
    %9 = vector.broadcast %cst_7 : f32 to vector<8x256xf32>
    %10 = arith.maximumf %8, %9 : vector<8x256xf32>
    %11 = arith.truncf %10 : vector<8x256xf32> to vector<8x256xbf16>
    %c0_8 = arith.constant 0 : index
    %c0_9 = arith.constant 0 : index
    %12 = vector.load %arg5[%c0_8, %c0_9] : memref<256x256xbf16, #tpu.memory_space<vmem>>, vector<256x256xbf16>
    %cst_10 = arith.constant dense<0.000000e+00> : vector<8x256xf32>
    %13 = tpu.matmul %11, %12, %cst_10 {dimension_numbers = #tpu.dot_dimension_numbers<[1], [0], [0], [1], [0, 0, 1, 1], [], []>} : vector<8x256xbf16>, vector<256x256xbf16>, vector<8x256xf32> -> vector<8x256xf32>
    %c0_11 = arith.constant 0 : index
    %c0_12 = arith.constant 0 : index
    %14 = vector.load %arg6[%c0_11, %c0_12] : memref<1x256xf32, #tpu.memory_space<vmem>>, vector<1x256xf32>
    %15 = vector.broadcast %14 : vector<1x256xf32> to vector<8x256xf32>
    %16 = arith.addf %13, %15 : vector<8x256xf32>
    %cst_13 = arith.constant 0.000000e+00 : f32
    %17 = vector.broadcast %cst_13 : f32 to vector<8x256xf32>
    %18 = arith.maximumf %16, %17 : vector<8x256xf32>
    %c0_14 = arith.constant 0 : index
    %c0_15 = arith.constant 0 : index
    %19 = vector.load %arg7[%c0_14, %c0_15] : memref<1x256xf32, #tpu.memory_space<vmem>>, vector<1x256xf32>
    %20 = vector.broadcast %19 : vector<1x256xf32> to vector<8x256xf32>
    %21 = arith.mulf %18, %20 : vector<8x256xf32>
    %cst_16 = arith.constant dense<0.000000e+00> : vector<8xf32>
    %22 = vector.multi_reduction <add>, %21, %cst_16 [1] : vector<8x256xf32> to vector<8xf32>
    %23 = vector.shape_cast %22 : vector<8xf32> to vector<8x1xf32>
    %c0_17 = arith.constant 0 : index
    %c0_18 = arith.constant 0 : index
    %24 = memref.load %arg8[%c0_17, %c0_18] : memref<1x1xf32, #tpu.memory_space<smem>>
    %25 = vector.broadcast %24 : f32 to vector<8x1xf32>
    %26 = arith.addf %23, %25 : vector<8x1xf32>
    %c0_19 = arith.constant 0 : index
    %c0_20 = arith.constant 0 : index
    %27 = vector.load %arg9[%c0_19, %c0_20] : memref<8x1xf32, #tpu.memory_space<vmem>>, vector<8x1xf32>
    tpu.vector_store %arg9[%c0_19, %c0_20], %26 {strides = array<i32>} : memref<8x1xf32, #tpu.memory_space<vmem>>, vector<8x1xf32>,
    return
  }
  func.func @transform_0(%arg0: i32) -> (i32, i32) {
    %c0_i32 = arith.constant 0 : i32
    %c0_i32_0 = arith.constant 0 : i32
    return %arg0, %c0_i32 : i32, i32
  }
  func.func @transform_1(%arg0: i32) -> (i32, i32) {
    %c0_i32 = arith.constant 0 : i32
    %c0_i32_0 = arith.constant 0 : i32
    return %arg0, %c0_i32 : i32, i32
  }
  func.func @transform_2(%arg0: i32) -> (i32, i32) {
    %c0_i32 = arith.constant 0 : i32
    %c0_i32_0 = arith.constant 0 : i32
    %c0_i32_1 = arith.constant 0 : i32
    return %c0_i32, %c0_i32_0 : i32, i32
  }
  func.func @transform_3(%arg0: i32) -> (i32, i32) {
    %c0_i32 = arith.constant 0 : i32
    %c0_i32_0 = arith.constant 0 : i32
    %c0_i32_1 = arith.constant 0 : i32
    return %c0_i32, %c0_i32_0 : i32, i32
  }
  func.func @transform_4(%arg0: i32) -> (i32, i32) {
    %c0_i32 = arith.constant 0 : i32
    %c0_i32_0 = arith.constant 0 : i32
    %c0_i32_1 = arith.constant 0 : i32
    return %c0_i32, %c0_i32_0 : i32, i32
  }
  func.func @transform_5(%arg0: i32) -> (i32, i32) {
    %c0_i32 = arith.constant 0 : i32
    %c0_i32_0 = arith.constant 0 : i32
    %c0_i32_1 = arith.constant 0 : i32
    return %c0_i32, %c0_i32_0 : i32, i32
  }
  func.func @transform_6(%arg0: i32) -> (i32, i32) {
    %c0_i32 = arith.constant 0 : i32
    %c0_i32_0 = arith.constant 0 : i32
    %c0_i32_1 = arith.constant 0 : i32
    return %c0_i32, %c0_i32_0 : i32, i32
  }
  func.func @transform_7(%arg0: i32) -> (i32, i32) {
    %c0_i32 = arith.constant 0 : i32
    %c0_i32_0 = arith.constant 0 : i32
    %c0_i32_1 = arith.constant 0 : i32
    return %c0_i32, %c0_i32_0 : i32, i32
  }
  func.func @transform_8(%arg0: i32) -> (i32, i32) {
    %c0_i32 = arith.constant 0 : i32
    %c0_i32_0 = arith.constant 0 : i32
    return %arg0, %c0_i32 : i32, i32
  }
}

</mosaic_0001>

<bundles_post_ra>
// kernel: tpu_custom_call.1
= control target key start
LH: loop header
LB: loop body
LE: loop exit
PB: predicated region body
PF: predicated region fallthrough
CT: control target
= control target key end

     0   :  { %14 = vsyncpa [#allocation4], 0  ;;  %s718_s0 = inlined_call_operand.hbm [shape: f32[8,16], index: 0, kind: input, shape index: {}]   ;;  %s719_s1 = inlined_call_operand.hbm [shape: f32[8,8], index: 1, kind: input, shape index: {}]   ;;  %s720_s2 = inlined_call_operand.hbm [shape: bf16[24,256], index: 2, kind: input, shape index: {}]   ;;  %s721_s3 = inlined_call_operand.vmem [shape: f32[1,256], index: 3, kind: input, shape index: {}]   ;;  %s722_s4 = inlined_call_operand.hbm [shape: bf16[256,256], index: 4, kind: input, shape index: {}]   ;;  %s723_s5 = inlined_call_operand.vmem [shape: f32[1,256], index: 5, kind: input, shape index: {}]   ;;  %s724_s6 = inlined_call_operand.vmem [shape: f32[1,256], index: 6, kind: input, shape index: {}]   ;;  %s725_s7 = inlined_call_operand.<no memory space> [shape: f32[1,1], index: 7, kind: input, shape index: {}]   ;;  %s726_s8 = inlined_call_operand.vmem [shape: f32[8,1], index: 8, kind: output, shape index: {}]  }
   0x1   :  { %15 = vsyncpa [#allocation6], 0 }
   0x2   :  { %16 = vsyncpa [#allocation9], 0  ;;  %s638_s27 = smov [#allocation5]   ;;  %s639_s29 = smov [#allocation3]  }
   0x3   :  { %s33_s28 = sshll.u32 %s638_s27, 4  ;;  %s23_s30 = sshll.u32 %s639_s29, 4  ;;  %s34_s28 = int_to_ptr.vmem [resolvable:$true] %s33_s28  ;;  %s24_s30 = int_to_ptr.vmem [resolvable:$true] %s23_s30 }
   0x4   :  { %s560_s9 = scalar_lea.vmem %s34_s28, 128  ;;  %p565_p1 = scmp.lt.s32.totalorder %s34_s28, %s34_s28 }
   0x5   :  { %p561_p0 = scmp.ne.s32.totalorder %s34_s28, %s560_s9  ;;  %p566_p2 = scmp.lt.s32.totalorder %s560_s9, %s560_s9 }
   0x7   :  { %p567_p3 = por %p566_p2, %p565_p1 }
   0x9   :  { %p568_p4 = pnand %p567_p3, %p561_p0 }
   0xb   :  { %571 = shalt.err (!%p568_p4)
}
   0xc   :  { %36 = dma.hbm_to_vmem [thread:$0]  %s719_s1, 128, %s34_s28, [#allocation6]  }
   0xd   :  { %s580_s12 = scalar_lea.vmem %s24_s30, 128  ;;  %p585_p6 = scmp.lt.s32.totalorder %s24_s30, %s24_s30 }
   0xe   :  { %p581_p5 = scmp.ne.s32.totalorder %s24_s30, %s580_s12  ;;  %p586_p7 = scmp.lt.s32.totalorder %s580_s12, %s580_s12 }
  0x10   :  { %p587_p8 = por %p586_p7, %p585_p6 }
  0x12   :  { %p588_p9 = pnand %p587_p8, %p581_p5 }
  0x14   :  { %591 = shalt.err (!%p588_p9)
}
  0x15   :  { %26 = dma.hbm_to_vmem [thread:$0]  %s718_s0, 128, %s24_s30, [#allocation4]  }
  0x16   :  { %s640_s15 = smov [#allocation7]  }
  0x17   :  { %s42_s16 = sshll.u32 %s640_s15, 4  ;;  %s43_s16 = int_to_ptr.vmem [resolvable:$true] %s42_s16 }
  0x18   :  { %s600_s17 = scalar_lea.vmem %s43_s16, 384  ;;  %p605_p11 = scmp.lt.s32.totalorder %s43_s16, %s43_s16 }
  0x19   :  { %p601_p10 = scmp.ne.s32.totalorder %s43_s16, %s600_s17  ;;  %p606_p12 = scmp.lt.s32.totalorder %s600_s17, %s600_s17 }
  0x1b   :  { %p607_p13 = por %p606_p12, %p605_p11 }
  0x1d   :  { %p608_p0 = pnand %p607_p13, %p601_p10 }
  0x1f   :  { %611 = shalt.err (!%p608_p0)
}
  0x20   :  { %s641_s1 = smov 128   ;;  %s642_s18 = smov 8  }
  0x21   :  { %48 = dma.hbm_to_vmem [thread:$0]  %s720_s2, 384, %s43_s16, [#allocation6], %s641_s1, %s641_s1, %s642_s18  }
  0x22   :  { %s643_s21 = smov [#allocation8]  }
  0x23   :  { %s56_s22 = sshll.u32 %s643_s21, 4  ;;  %s57_s22 = int_to_ptr.vmem [resolvable:$true] %s56_s22 }
  0x24   :  { %s620_s0 = scalar_lea.vmem %s57_s22, 4096  ;;  %p625_p2 = scmp.lt.s32.totalorder %s57_s22, %s57_s22 }
  0x25   :  { %p621_p1 = scmp.ne.s32.totalorder %s57_s22, %s620_s0  ;;  %p626_p3 = scmp.lt.s32.totalorder %s620_s0, %s620_s0 }
  0x27   :  { %p627_p4 = por %p626_p3, %p625_p2 }
  0x29   :  { %p628_p5 = pnand %p627_p4, %p621_p1 }
  0x2b   :  { %631 = shalt.err (!%p628_p5)
}
  0x2c   :  { %62 = dma.hbm_to_vmem [thread:$0]  %s722_s4, 4096, %s57_s22, [#allocation9], %s641_s1, %s641_s1, %s642_s18  }
  0x2d   :  { %632 = dma.done.wait [#allocation4], 128  }
  0x2e   :  { %633 = vsyncadd [#allocation4], 4294967168 }
  0x2f   :  { %634 = dma.done.wait [#allocation6], 512  }
  0x30   :  { %635 = vsyncadd [#allocation6], 4294966784 }
  0x31   :  { %636 = dma.done.wait [#allocation9], 4096  }
  0x32   :  { %637 = vsyncadd [#allocation9], 4294963200  ;;  %v644_v0 = vmov 0   ;;  %v83_v1 = vld [vmem:[#allocation5] sm:$0xff]  ;;  %v93_v2 = vld [vmem:[#allocation7 + $0x10] sm:$0xff]  ;;  %vm125_vm0 = vcmask 1043456   ;;  %v96_v44 = vlaneseq }
  0x33   :  { %164 = vmatprep.mubr.bf16.mxu0 %v644_v0  ;;  %s645_s2 = smov 16   ;;  %v456_v3 = vcombine.high %v93_v2, %v93_v2  ;;  %v455_v4 = vcombine.low %v93_v2, %v93_v2  ;;  %v501_v5 = vld [vmem:[#allocation7 + $0x4] ss:$8 sps:$4 sm:$0xff]   ;;  %v506_v8 = vld [vmem:[#allocation8 + $0x70] ss:$8 sps:$4 sm:$0xff]   ;;  %vm88_vm1 = vcmask 130048  }
  0x34   :  { %85 = vrot.lane.b32.xlu0 %v83_v1, %s645_s2  ;;  %v504_v7 = vld [vmem:[#allocation8 + $0x74] ss:$8 sps:$4 sm:$0xff]   ;;  %v503_v9 = vld [vmem:[#allocation7] ss:$8 sps:$4 sm:$0xff]   ;;  %v507_v10 = vld [vmem:[#allocation8 + $0x64] ss:$8 sps:$4 sm:$0xff]  }
  0x35   :  { %457 = vmatprep.subr.msk.bf16.mxu0 %vm125_vm0, %v456_v3  ;;  %v127_v6 = vsel %vm125_vm0, %v455_v4, 0  ;;  %381 = vmatprep.subr.bf16.mxu1 %v504_v7  ;;  %v509_v11 = vld [vmem:[#allocation8 + $0x60] ss:$8 sps:$4 sm:$0xff]   ;;  %v510_v12 = vld [vmem:[#allocation8 + $0x54] ss:$8 sps:$4 sm:$0xff]   ;;  %vm121_vm2 = vcmask 195584  }
  0x36   :  { %145 = vmatpush1.bf16.msra.mxu0 %v127_v6  ;;  %382 = vmatpush1.bf16.msra.mxu1 %v506_v8  ;;  %v512_v13 = vld [vmem:[#allocation8 + $0x50] ss:$8 sps:$4 sm:$0xff]   ;;  %v513_v14 = vld [vmem:[#allocation8 + $0x44] ss:$8 sps:$4 sm:$0xff]   ;;  %v515_v15 = vld [vmem:[#allocation8 + $0x40] ss:$8 sps:$4 sm:$0xff]  }
  0x37   :  { %146 = vmatprep.subr.bf16.mxu0 %v501_v5  ;;  %383 = vmatprep.subr.bf16.mxu1 %v507_v10  ;;  %v516_v16 = vld [vmem:[#allocation8 + $0x34] ss:$8 sps:$4 sm:$0xff]   ;;  %v518_v17 = vld [vmem:[#allocation8 + $0x30] ss:$8 sps:$4 sm:$0xff]   ;;  %v519_v18 = vld [vmem:[#allocation8 + $0x24] ss:$8 sps:$4 sm:$0xff]  }
  0x38   :  { %v521_v19 = vld [vmem:[#allocation8 + $0x20] ss:$8 sps:$4 sm:$0xff]   ;;  %v522_v20 = vld [vmem:[#allocation8 + $0x14] ss:$8 sps:$4 sm:$0xff]   ;;  %v524_v21 = vld [vmem:[#allocation8 + $0x10] ss:$8 sps:$4 sm:$0xff]  }
  0x39   :  { %v525_v22 = vld [vmem:[#allocation8 + $0x4] ss:$8 sps:$4 sm:$0xff]   ;;  %v527_v23 = vld [vmem:[#allocation8] ss:$8 sps:$4 sm:$0xff]   ;;  %v528_v24 = vld [vmem:[#allocation8 + $0xf4] ss:$8 sps:$4 sm:$0xff]  }
  0x3a   :  { %147 = vmatpush1.bf16.msra.mxu0 %v503_v9  ;;  %384 = vmatpush1.bf16.msra.mxu1 %v509_v11  ;;  %v530_v25 = vld [vmem:[#allocation8 + $0xf0] ss:$8 sps:$4 sm:$0xff]   ;;  %v531_v26 = vld [vmem:[#allocation8 + $0xe4] ss:$8 sps:$4 sm:$0xff]   ;;  %v533_v27 = vld [vmem:[#allocation8 + $0xe0] ss:$8 sps:$4 sm:$0xff]  }
  0x3b   :  { %385 = vmatprep.subr.bf16.mxu1 %v510_v12  ;;  %v534_v28 = vld [vmem:[#allocation8 + $0xd4] ss:$8 sps:$4 sm:$0xff]   ;;  %v536_v29 = vld [vmem:[#allocation8 + $0xd0] ss:$8 sps:$4 sm:$0xff]   ;;  %v537_v30 = vld [vmem:[#allocation8 + $0xc4] ss:$8 sps:$4 sm:$0xff]  }
  0x3c   :  { %v539_v31 = vld [vmem:[#allocation8 + $0xc0] ss:$8 sps:$4 sm:$0xff]   ;;  %v540_v32 = vld [vmem:[#allocation8 + $0xb4] ss:$8 sps:$4 sm:$0xff]   ;;  %v542_v33 = vld [vmem:[#allocation8 + $0xb0] ss:$8 sps:$4 sm:$0xff]  }
  0x3d   :  { %v543_v34 = vld [vmem:[#allocation8 + $0xa4] ss:$8 sps:$4 sm:$0xff]   ;;  %v545_v35 = vld [vmem:[#allocation8 + $0xa0] ss:$8 sps:$4 sm:$0xff]   ;;  %v82_v36 = vld [vmem:[#allocation3] sm:$0xff]  ;;  %v97_v45 = vshrl.u32 %v96_v44, 7 }
  0x3e   :  { %386 = vmatpush1.bf16.msra.mxu1 %v512_v13  ;;  %v546_v40 = vld [vmem:[#allocation8 + $0x94] ss:$8 sps:$4 sm:$0xff]   ;;  %v548_v41 = vld [vmem:[#allocation8 + $0x90] ss:$8 sps:$4 sm:$0xff]   ;;  %v549_v42 = vld [vmem:[#allocation8 + $0x84] ss:$8 sps:$4 sm:$0xff]  }
  0x3f   :  { %387 = vmatprep.subr.bf16.mxu1 %v513_v14  ;;  %v551_v43 = vld [vmem:[#allocation8 + $0x80] ss:$8 sps:$4 sm:$0xff]   ;;  %v98_v46 = vsub.s32 0, %v97_v45  ;;  %v94_v47 = vld [vmem:[%s721_s3] sm:$0x3]  ;;  %v102_v48 = vsub.s32 1, %v97_v45  ;;  %v442_v14 = vstv %s725_s7 }
  0x40   :  { %v209_v61 = vld [vmem:[%s723_s5] sm:$0x3]  ;;  %vm444_vm3 = vcmask 7168  }
  0x41   :  { %v99_v49 = vrot.slane %v94_v47, %v98_v46  ;;  %v103_v50 = vrot.slane %v94_v47, %v102_v48  ;;  %v214_v62 = vrot.slane %v209_v61, %v98_v46  ;;  %v218_v63 = vrot.slane %v209_v61, %v102_v48  ;;  %v424_v1 = vld [vmem:[%s724_s6] sm:$0x3] }
  0x42   :  { %388 = vmatpush1.bf16.msra.mxu1 %v515_v15  ;;  %v429_v5 = vrot.slane %v424_v1, %v98_v46  ;;  %v433_v7 = vrot.slane %v424_v1, %v102_v48 }
  0x43   :  { %389 = vmatprep.subr.bf16.mxu1 %v516_v16 }
  0x46   :  { %390 = vmatpush1.bf16.msra.mxu1 %v518_v17 }
  0x47   :  { %391 = vmatprep.subr.bf16.mxu1 %v519_v18 }
  0x4a   :  { %392 = vmatpush1.bf16.msra.mxu1 %v521_v19 }
  0x4b   :  { %393 = vmatprep.subr.bf16.mxu1 %v522_v20 }
  0x4e   :  { %394 = vmatpush1.bf16.msra.mxu1 %v524_v21 }
  0x4f   :  { %395 = vmatprep.subr.bf16.mxu1 %v525_v22 }
  0x52   :  { %396 = vmatpush1.bf16.msra.mxu1 %v527_v23 }
  0x53   :  { %397 = vmatprep.subr.bf16.mxu1 %v528_v24 }
  0x56   :  { %398 = vmatpush2.bf16.msra.mxu1 %v530_v25 }
  0x57   :  { %399 = vmatprep.subr.bf16.mxu1 %v531_v26 }
  0x5a   :  { %400 = vmatpush2.bf16.msra.mxu1 %v533_v27 }
  0x5b   :  { %401 = vmatprep.subr.bf16.mxu1 %v534_v28 }
  0x5e   :  { %402 = vmatpush2.bf16.msra.mxu1 %v536_v29 }
  0x5f   :  { %403 = vmatprep.subr.bf16.mxu1 %v537_v30 }
  0x62   :  { %404 = vmatpush2.bf16.msra.mxu1 %v539_v31 }
  0x63   :  { %405 = vmatprep.subr.bf16.mxu1 %v540_v32 }
  0x66   :  { %406 = vmatpush2.bf16.msra.mxu1 %v542_v33 }
  0x67   :  { %407 = vmatprep.subr.bf16.mxu1 %v543_v34 }
  0x6a   :  { %408 = vmatpush2.bf16.msra.mxu1 %v545_v35 }
  0x6b   :  { %409 = vmatprep.subr.bf16.mxu1 %v546_v40 }
  0x6e   :  { %410 = vmatpush2.bf16.msra.mxu1 %v548_v41 }
  0x6f   :  { %411 = vmatprep.subr.bf16.mxu1 %v549_v42 }
  0x72   :  { %412 = vmatpush2.bf16.msra.mxu1 %v551_v43 }
  0xa6   :  { %v86_v37 = vpop.permute.xlu0 %85 }
  0xa7   :  { %v89_v38 = vsel %vm88_vm1, %v82_v36, %v86_v37 }
  0xa8   :  { %v90_v39 = vpack.c.bf16 %v89_v38, %v89_v38 }
  0xaa   :  { %458 = vmatmul.mubr.msk.bf16.vlgmr.msra.gmra.mxu0 %vm121_vm2, %v90_v39 }
 0x16a   :  { %v166_v51 = vpop.f32.mrf.mxu0 }
 0x16b   :  { %v167_v52 = vadd.f32 %v166_v51, %v99_v49 }
 0x16c   :  { %v168_v53 = vpop.f32.mrf.mxu0 }
 0x16d   :  { %v169_v54 = vadd.f32 %v168_v53, %v103_v50  ;;  %v173_v55 = vmax.f32 %v167_v52, 0.0 }
 0x16e   :  { %v170_v56 = vpop.f32.mrf.mxu0 }
 0x16f   :  { %v174_v57 = vmax.f32 %v169_v54, 0.0  ;;  %v175_v60 = vpack.c.bf16 %v173_v55, %v173_v55 }
 0x170   :  { %v171_v58 = vpop.f32.mrf.mxu0 }
 0x171   :  { %v176_v59 = vpack.c.bf16 %v174_v57, %v174_v57 }
 0x173   :  { %413 = vmatprep.mubr.bf16.mxu1 %v176_v59 }
 0x174   :  { %414 = vmatmul.mubr.bf16.vlgmr.msra.gmra.mxu1 %v175_v60 }
 0x234   :  { %v415_v0 = vpop.f32.mrf.mxu1 }
 0x235   :  { %v416_v2 = vadd.f32 %v415_v0, %v214_v62 }
 0x236   :  { %v417_v3 = vpop.f32.mrf.mxu1 }
 0x237   :  { %v422_v4 = vmax.f32 %v416_v2, 0.0  ;;  %v418_v6 = vadd.f32 %v417_v3, %v218_v63 }
 0x238   :  { %v419_v8 = vpop.f32.mrf.mxu1 }
 0x239   :  { %v423_v9 = vmax.f32 %v418_v6, 0.0  ;;  %v436_v11 = vmul.f32 %v429_v5, %v422_v4 }
 0x23a   :  { %v420_v10 = vpop.f32.mrf.mxu1 }
 0x23b   :  { %v437_v12 = vmul.f32 %v433_v7, %v423_v9 }
 0x23d   :  { %v438_v13 = vadd.f32 %v437_v12, %v436_v11 }
 0x23f   :  { %439 = vadd.xlane.f32.xlu0 %v438_v13 }
 0x2c8   :  { %v440_v15 = vpop.xlane.xlu0 %439 }
 0x2c9   :  { %v443_v16 = vadd.f32 %v442_v14, %v440_v15 }
 0x2cb   :  { %445 = vst.msk [vmem:[%s726_s8] sm:$0xff] %vm444_vm3, %v443_v16 }
 0x2cc   :  { %450 = vsyncpa [#allocation4], 1 }
 0x2cd   :  { %451 = vsyncpa [#allocation6], 1 }
 0x2ce   :  { %452 = vsyncpa [#allocation9], 1 }

</bundles_post_ra>
